<compile_context>
chip_gen: v5e
topology: v5e:2x2
jax: 0.10.0
libtpu: 0.0.40
codegen_flags: <defaults>
</compile_context>

<pallas_src>
import jax
import jax.numpy as jnp
from jax.experimental import pallas as pl
from jax.experimental.pallas import tpu as pltpu

# (in_features, out_features) per layer, matching nn.Linear shapes in __init__.
LAYER_DIMS = [(28 * 28, 128), (128, 128), (128, 64), (64, 32), (32, 16), (16, 10)]
PAD = 128            # lane-dense padded out_features for every layer
NUM_LAYERS = len(LAYER_DIMS)


def mlp_kernel(x_ref, w1_ref, wr_ref, b_ref, o_ref):
    """Fused 6-layer MLP forward on one batch tile (all weights in VMEM).

    x_ref : (tile, 784)  bf16
    w1_ref: (784, 128)   bf16   (fc1 weight, out-dim already 128)
    wr_ref: (5, 128, 128) bf16  (fc2..fc6 weights, zero-padded to 128x128)
    b_ref : (6, 128)     f32    (all biases, zero-padded to 128 lanes)
    o_ref : (tile, 128)  f32    (padded logits; caller slices [:, :10])
    """
    # fc1 + relu  (bf16 operands, f32 accumulation on the MXU)
    h = jnp.dot(x_ref[...], w1_ref[...], preferred_element_type=jnp.float32)
    h = jnp.maximum(h + b_ref[0:1, :], 0.0)

    # fc2..fc5 (+relu), fc6 (no activation).  Static Python loop -> unrolled.
    for l in range(1, NUM_LAYERS):
        h = jnp.dot(h.astype(jnp.bfloat16), wr_ref[l - 1],
                    preferred_element_type=jnp.float32)
        h = h + b_ref[l:l + 1, :]
        if l < NUM_LAYERS - 1:
            h = jnp.maximum(h, 0.0)

    o_ref[...] = h.astype(o_ref.dtype)


def pack_params(params):
    """Pack per-layer (W (in,out), b (out,)) into lane-padded bf16/f32 arrays."""
    d0_in, d0_out = LAYER_DIMS[0]
    w1 = jnp.zeros((d0_in, PAD), jnp.bfloat16)
    w1 = w1.at[:, :d0_out].set(params[0][0].astype(jnp.bfloat16))

    w_rest = jnp.zeros((NUM_LAYERS - 1, PAD, PAD), jnp.bfloat16)
    b_all = jnp.zeros((NUM_LAYERS, PAD), jnp.float32)
    b_all = b_all.at[0, :d0_out].set(params[0][1].astype(jnp.float32))

    for l in range(1, NUM_LAYERS):
        din, dout = LAYER_DIMS[l]
        w_rest = w_rest.at[l - 1, :din, :dout].set(params[l][0].astype(jnp.bfloat16))
        b_all = b_all.at[l, :dout].set(params[l][1].astype(jnp.float32))
    return w1, w_rest, b_all


def net_forward(x, params, *, batch_tile=256):
    """x: (B, 784).  params: list of (W (in,out), b (out,)) per layer -> (B, 10)."""
    B, D = x.shape
    assert D == LAYER_DIMS[0][0]

    w1, w_rest, b_all = pack_params(params)

    # Pad batch up to a tile multiple (wasted rows are zero; sliced off below).
    pad_B = pl.cdiv(B, batch_tile) * batch_tile
    xb = x.astype(jnp.bfloat16)
    if pad_B != B:
        xb = jnp.pad(xb, ((0, pad_B - B), (0, 0)))

    in_specs = [
        pl.BlockSpec((batch_tile, D), lambda i: (i, 0)),          # x tile
        pl.BlockSpec((D, PAD), lambda i: (0, 0)),                 # fc1 weight
        pl.BlockSpec((NUM_LAYERS - 1, PAD, PAD), lambda i: (0, 0, 0)),  # fc2..fc6
        pl.BlockSpec((NUM_LAYERS, PAD), lambda i: (0, 0)),        # all biases
    ]
    out_spec = pl.BlockSpec((batch_tile, PAD), lambda i: (i, 0))

    out = pl.pallas_call(
        mlp_kernel,
        out_shape=jax.ShapeDtypeStruct((pad_B, PAD), jnp.float32),
        grid_spec=pltpu.PrefetchScalarGridSpec(
            num_scalar_prefetch=0,
            grid=(pad_B // batch_tile,),
            in_specs=in_specs,
            out_specs=out_spec,
        ),
        compiler_params=pltpu.CompilerParams(
            dimension_semantics=("parallel",)),
    )(xb, w1, w_rest, b_all)

    return out[:B, :LAYER_DIMS[-1][1]]


def init_params(key):
    """Deterministic init mimicking torch.nn.Linear default (uniform +/-1/sqrt(fan_in))."""
    params = []
    for (din, dout) in LAYER_DIMS:
        key, kw, kb = jax.random.split(key, 3)
        bound = 1.0 / (din ** 0.5)
        w = jax.random.uniform(kw, (din, dout), jnp.float32, -bound, bound)
        b = jax.random.uniform(kb, (dout,), jnp.float32, -bound, bound)
        params.append((w, b))
    return params


def reference_forward(x, params):
    """Plain-JAX reference with the same bf16-operand / f32-accumulate numerics."""
    h = x
    for i, (w, b) in enumerate(params):
        h = jnp.dot(h.astype(jnp.bfloat16), w.astype(jnp.bfloat16),
                    preferred_element_type=jnp.float32) + b
        if i < len(params) - 1:
            h = jnp.maximum(h, 0.0)
    return h


if __name__ == "__main__":
    key = jax.random.PRNGKey(0)
    kx, kp = jax.random.split(key)

    # Small demo: B=30 exercises the ragged-batch padding path; batch_tile=16
    # keeps >=2 grid steps so both v7x TensorCores get work even at this size.
    B = 30
    x = jax.random.normal(kx, (B, 28 * 28), jnp.float32)
    params = init_params(kp)

    out = net_forward(x, params, batch_tile=16)
    out = jax.block_until_ready(out)

    ref = reference_forward(x, params)
    assert out.shape == (B, 10)
    assert jnp.allclose(out, ref, atol=1e-2, rtol=1e-2), "mismatch vs. reference"

    print("KERNEL_OK")
</pallas_src>

<mosaic_0001>
module attributes {stable_mosaic.version = 11 : i64} {
  func.func @mlp_kernel(%arg0: i32, %arg1: memref<16x784xbf16, #tpu.memory_space<vmem>>, %arg2: memref<784x128xbf16, #tpu.memory_space<vmem>>, %arg3: memref<5x128x128xbf16, #tpu.memory_space<vmem>>, %arg4: memref<6x128xf32, #tpu.memory_space<vmem>>, %arg5: memref<16x128xf32, #tpu.memory_space<vmem>>) attributes {dimension_semantics = [#tpu.dimension_semantics<parallel>], iteration_bounds = array<i64: 2>, scalar_prefetch = 0 : i64, scratch_operands = 0 : i64, tpu.core_type = #tpu.core_type<tc>, window_params = [{transform_indices = @transform_0, window_bounds = array<i64: 16, 784>}, {pipeline_mode = #tpu.pipeline_mode<synchronous>, transform_indices = @transform_1, window_bounds = array<i64: 784, 128>}, {pipeline_mode = #tpu.pipeline_mode<synchronous>, transform_indices = @transform_2, window_bounds = array<i64: 5, 128, 128>}, {pipeline_mode = #tpu.pipeline_mode<synchronous>, transform_indices = @transform_3, window_bounds = array<i64: 6, 128>}, {transform_indices = @transform_4, window_bounds = array<i64: 16, 128>}]} {
    %c0 = arith.constant 0 : index
    %c0_0 = arith.constant 0 : index
    %0 = vector.load %arg1[%c0, %c0_0] : memref<16x784xbf16, #tpu.memory_space<vmem>>, vector<16x784xbf16>
    %c0_1 = arith.constant 0 : index
    %c0_2 = arith.constant 0 : index
    %1 = vector.load %arg2[%c0_1, %c0_2] : memref<784x128xbf16, #tpu.memory_space<vmem>>, vector<784x128xbf16>
    %cst = arith.constant dense<0.000000e+00> : vector<16x128xf32>
    %2 = tpu.matmul %0, %1, %cst {dimension_numbers = #tpu.dot_dimension_numbers<[1], [0], [0], [1], [0, 0, 1, 1], [], []>} : vector<16x784xbf16>, vector<784x128xbf16>, vector<16x128xf32> -> vector<16x128xf32>
    %c0_3 = arith.constant 0 : index
    %c0_4 = arith.constant 0 : index
    %3 = vector.load %arg4[%c0_3, %c0_4] : memref<6x128xf32, #tpu.memory_space<vmem>>, vector<1x128xf32>
    %4 = vector.broadcast %3 : vector<1x128xf32> to vector<16x128xf32>
    %5 = arith.addf %2, %4 : vector<16x128xf32>
    %cst_5 = arith.constant 0.000000e+00 : f32
    %6 = vector.broadcast %cst_5 : f32 to vector<16x128xf32>
    %7 = arith.maximumf %5, %6 : vector<16x128xf32>
    %8 = arith.truncf %7 : vector<16x128xf32> to vector<16x128xbf16>
    %c0_6 = arith.constant 0 : index
    %c0_7 = arith.constant 0 : index
    %c0_8 = arith.constant 0 : index
    %9 = vector.load %arg3[%c0_6, %c0_7, %c0_8] : memref<5x128x128xbf16, #tpu.memory_space<vmem>>, vector<1x128x128xbf16>
    %10 = vector.shape_cast %9 : vector<1x128x128xbf16> to vector<128x128xbf16>
    %cst_9 = arith.constant dense<0.000000e+00> : vector<16x128xf32>
    %11 = tpu.matmul %8, %10, %cst_9 {dimension_numbers = #tpu.dot_dimension_numbers<[1], [0], [0], [1], [0, 0, 1, 1], [], []>} : vector<16x128xbf16>, vector<128x128xbf16>, vector<16x128xf32> -> vector<16x128xf32>
    %c1 = arith.constant 1 : index
    %c0_10 = arith.constant 0 : index
    %12 = vector.load %arg4[%c1, %c0_10] : memref<6x128xf32, #tpu.memory_space<vmem>>, vector<1x128xf32>
    %13 = vector.broadcast %12 : vector<1x128xf32> to vector<16x128xf32>
    %14 = arith.addf %11, %13 : vector<16x128xf32>
    %cst_11 = arith.constant 0.000000e+00 : f32
    %15 = vector.broadcast %cst_11 : f32 to vector<16x128xf32>
    %16 = arith.maximumf %14, %15 : vector<16x128xf32>
    %17 = arith.truncf %16 : vector<16x128xf32> to vector<16x128xbf16>
    %c1_12 = arith.constant 1 : index
    %c0_13 = arith.constant 0 : index
    %c0_14 = arith.constant 0 : index
    %18 = vector.load %arg3[%c1_12, %c0_13, %c0_14] : memref<5x128x128xbf16, #tpu.memory_space<vmem>>, vector<1x128x128xbf16>
    %19 = vector.shape_cast %18 : vector<1x128x128xbf16> to vector<128x128xbf16>
    %cst_15 = arith.constant dense<0.000000e+00> : vector<16x128xf32>
    %20 = tpu.matmul %17, %19, %cst_15 {dimension_numbers = #tpu.dot_dimension_numbers<[1], [0], [0], [1], [0, 0, 1, 1], [], []>} : vector<16x128xbf16>, vector<128x128xbf16>, vector<16x128xf32> -> vector<16x128xf32>
    %c2 = arith.constant 2 : index
    %c0_16 = arith.constant 0 : index
    %21 = vector.load %arg4[%c2, %c0_16] : memref<6x128xf32, #tpu.memory_space<vmem>>, vector<1x128xf32>
    %22 = vector.broadcast %21 : vector<1x128xf32> to vector<16x128xf32>
    %23 = arith.addf %20, %22 : vector<16x128xf32>
    %cst_17 = arith.constant 0.000000e+00 : f32
    %24 = vector.broadcast %cst_17 : f32 to vector<16x128xf32>
    %25 = arith.maximumf %23, %24 : vector<16x128xf32>
    %26 = arith.truncf %25 : vector<16x128xf32> to vector<16x128xbf16>
    %c2_18 = arith.constant 2 : index
    %c0_19 = arith.constant 0 : index
    %c0_20 = arith.constant 0 : index
    %27 = vector.load %arg3[%c2_18, %c0_19, %c0_20] : memref<5x128x128xbf16, #tpu.memory_space<vmem>>, vector<1x128x128xbf16>
    %28 = vector.shape_cast %27 : vector<1x128x128xbf16> to vector<128x128xbf16>
    %cst_21 = arith.constant dense<0.000000e+00> : vector<16x128xf32>
    %29 = tpu.matmul %26, %28, %cst_21 {dimension_numbers = #tpu.dot_dimension_numbers<[1], [0], [0], [1], [0, 0, 1, 1], [], []>} : vector<16x128xbf16>, vector<128x128xbf16>, vector<16x128xf32> -> vector<16x128xf32>
    %c3 = arith.constant 3 : index
    %c0_22 = arith.constant 0 : index
    %30 = vector.load %arg4[%c3, %c0_22] : memref<6x128xf32, #tpu.memory_space<vmem>>, vector<1x128xf32>
    %31 = vector.broadcast %30 : vector<1x128xf32> to vector<16x128xf32>
    %32 = arith.addf %29, %31 : vector<16x128xf32>
    %cst_23 = arith.constant 0.000000e+00 : f32
    %33 = vector.broadcast %cst_23 : f32 to vector<16x128xf32>
    %34 = arith.maximumf %32, %33 : vector<16x128xf32>
    %35 = arith.truncf %34 : vector<16x128xf32> to vector<16x128xbf16>
    %c3_24 = arith.constant 3 : index
    %c0_25 = arith.constant 0 : index
    %c0_26 = arith.constant 0 : index
    %36 = vector.load %arg3[%c3_24, %c0_25, %c0_26] : memref<5x128x128xbf16, #tpu.memory_space<vmem>>, vector<1x128x128xbf16>
    %37 = vector.shape_cast %36 : vector<1x128x128xbf16> to vector<128x128xbf16>
    %cst_27 = arith.constant dense<0.000000e+00> : vector<16x128xf32>
    %38 = tpu.matmul %35, %37, %cst_27 {dimension_numbers = #tpu.dot_dimension_numbers<[1], [0], [0], [1], [0, 0, 1, 1], [], []>} : vector<16x128xbf16>, vector<128x128xbf16>, vector<16x128xf32> -> vector<16x128xf32>
    %c4 = arith.constant 4 : index
    %c0_28 = arith.constant 0 : index
    %39 = vector.load %arg4[%c4, %c0_28] : memref<6x128xf32, #tpu.memory_space<vmem>>, vector<1x128xf32>
    %40 = vector.broadcast %39 : vector<1x128xf32> to vector<16x128xf32>
    %41 = arith.addf %38, %40 : vector<16x128xf32>
    %cst_29 = arith.constant 0.000000e+00 : f32
    %42 = vector.broadcast %cst_29 : f32 to vector<16x128xf32>
    %43 = arith.maximumf %41, %42 : vector<16x128xf32>
    %44 = arith.truncf %43 : vector<16x128xf32> to vector<16x128xbf16>
    %c4_30 = arith.constant 4 : index
    %c0_31 = arith.constant 0 : index
    %c0_32 = arith.constant 0 : index
    %45 = vector.load %arg3[%c4_30, %c0_31, %c0_32] : memref<5x128x128xbf16, #tpu.memory_space<vmem>>, vector<1x128x128xbf16>
    %46 = vector.shape_cast %45 : vector<1x128x128xbf16> to vector<128x128xbf16>
    %cst_33 = arith.constant dense<0.000000e+00> : vector<16x128xf32>
    %47 = tpu.matmul %44, %46, %cst_33 {dimension_numbers = #tpu.dot_dimension_numbers<[1], [0], [0], [1], [0, 0, 1, 1], [], []>} : vector<16x128xbf16>, vector<128x128xbf16>, vector<16x128xf32> -> vector<16x128xf32>
    %c5 = arith.constant 5 : index
    %c0_34 = arith.constant 0 : index
    %48 = vector.load %arg4[%c5, %c0_34] : memref<6x128xf32, #tpu.memory_space<vmem>>, vector<1x128xf32>
    %49 = vector.broadcast %48 : vector<1x128xf32> to vector<16x128xf32>
    %50 = arith.addf %47, %49 : vector<16x128xf32>
    %c0_35 = arith.constant 0 : index
    %c0_36 = arith.constant 0 : index
    %51 = vector.load %arg5[%c0_35, %c0_36] : memref<16x128xf32, #tpu.memory_space<vmem>>, vector<16x128xf32>
    tpu.vector_store %arg5[%c0_35, %c0_36], %50 {strides = array<i32>} : memref<16x128xf32, #tpu.memory_space<vmem>>, vector<16x128xf32>,
    return
  }
  func.func @transform_0(%arg0: i32) -> (i32, i32) {
    %c0_i32 = arith.constant 0 : i32
    %c0_i32_0 = arith.constant 0 : i32
    return %arg0, %c0_i32 : i32, i32
  }
  func.func @transform_1(%arg0: i32) -> (i32, i32) {
    %c0_i32 = arith.constant 0 : i32
    %c0_i32_0 = arith.constant 0 : i32
    %c0_i32_1 = arith.constant 0 : i32
    return %c0_i32, %c0_i32_0 : i32, i32
  }
  func.func @transform_2(%arg0: i32) -> (i32, i32, i32) {
    %c0_i32 = arith.constant 0 : i32
    %c0_i32_0 = arith.constant 0 : i32
    %c0_i32_1 = arith.constant 0 : i32
    %c0_i32_2 = arith.constant 0 : i32
    return %c0_i32, %c0_i32_0, %c0_i32_1 : i32, i32, i32
  }
  func.func @transform_3(%arg0: i32) -> (i32, i32) {
    %c0_i32 = arith.constant 0 : i32
    %c0_i32_0 = arith.constant 0 : i32
    %c0_i32_1 = arith.constant 0 : i32
    return %c0_i32, %c0_i32_0 : i32, i32
  }
  func.func @transform_4(%arg0: i32) -> (i32, i32) {
    %c0_i32 = arith.constant 0 : i32
    %c0_i32_0 = arith.constant 0 : i32
    return %arg0, %c0_i32 : i32, i32
  }
}

</mosaic_0001>

<bundles_post_ra>
// kernel: tpu_custom_call.1
= control target key start
LH: loop header
LB: loop body
LE: loop exit
PB: predicated region body
PF: predicated region fallthrough
CT: control target
= control target key end

     0   :  { %9 = vsyncpa [#allocation3], 0  ;;  %s2346_s0 = inlined_call_operand.hbm [shape: bf16[32,784], index: 0, kind: input, shape index: {}]   ;;  %s2347_s1 = inlined_call_operand.hbm [shape: bf16[784,128], index: 1, kind: input, shape index: {}]   ;;  %s2348_s2 = inlined_call_operand.hbm [shape: bf16[5,128,128], index: 2, kind: input, shape index: {}]   ;;  %s2349_s3 = inlined_call_operand.hbm [shape: f32[6,128], index: 3, kind: input, shape index: {}]   ;;  %s2350_s4 = inlined_call_operand.hbm [shape: f32[32,128], index: 4, kind: output, shape index: {}]  }
   0x1   :  { %11 = vsyncpa [#allocation3 + $0x1], 0 }
   0x2   :  { %12 = vsyncpa [#allocation6], 0 }
   0x3   :  { %13 = vsyncpa [#allocation9], 0 }
   0x4   :  { %14 = vsyncpa [#allocation4], 0 }
   0x5   :  { %16 = vsyncpa [#allocation4 + $0x1], 0  ;;  %s2171_s15 = smov 0   ;;  %s2173_s16 = smov 0  }
   0x6   :  { %s2175_s17 = smov 0   ;;  %s2177_s18 = smov 0  }
   0x7 LB: > { %s2192_s19 = sadd.s32 4294967295, %s2135_s18   ;;  %s1348_s20 = sadd.s32 4294967294, %s2135_s18   ;;  %s2135_s18 = sphi %s2177_s18, %s2361_s18   ;;  %s2131_s17 = sphi %s2175_s17, %s2360_s17   ;;  %s2127_s16 = sphi %s2173_s16, %s2359_s16   ;;  %s2123_s15 = sphi %s2171_s15, %s2358_s15  }
   0x8   : > { %p42_p0 = scmp.ne.s32.totalorder %s2127_s16, %s2123_s15  ;;  %p43_p1 = scmp.eq.s32.totalorder %s2192_s19, 0 }
   0x9   : > { %p129_p2 = scmp.eq.s32.totalorder %s2192_s19, 1  ;;  %p135_p3 = scmp.eq.s32.totalorder %s1348_s20, 1 }
   0xa   : > { %p2201_p4 = por %p43_p1, %p42_p0  ;;  %p1349_p5 = scmp.ge.s32.totalorder %s2135_s18, 1 }
   0xb   : > { %p2206_p6 = por %p135_p3, %p42_p0  ;;  %p142_p7 = scmp.lt.s32.totalorder %s2135_s18, 3 }
   0xc   : > { %s153_s25 = sshll.u32 %s2347_s1, 4  ;;  %s2137_s27 = smov [#allocation5]   ;;  %s154_s25 = int_to_ptr.hbm [resolvable:$true] %s153_s25 }
   0xd   : > { %p2214_p8 = pnand %p1349_p5, %p142_p7  ;;  %s155_s28 = sshll.u32 %s2137_s27, 4  ;;  %s156_s28 = int_to_ptr.vmem [resolvable:$true] %s155_s28 }
   0xe   : > { %s167_s6 = sshll.u32 %s2348_s2, 4  ;;  %s2138_s7 = smov 64   ;;  %s168_s6 = int_to_ptr.hbm [resolvable:$true] %s167_s6 }
   0xf   : > { %p1868_p9 = pneg %p2214_p8  ;;  %s2139_s8 = smov 4  }
  0x10   : > { %s2140_s9 = smov [#allocation7]   ;;  %s182_s13 = sshll.u32 %s2349_s3, 4  ;;  %s183_s13 = int_to_ptr.hbm [resolvable:$true] %s182_s13 }
  0x11   : > { %p2222_p10 = pnand %p1868_p9, %p43_p1  ;;  %s169_s10 = sshll.u32 %s2140_s9, 4  ;;  %s170_s10 = int_to_ptr.vmem [resolvable:$true] %s169_s10 }
  0x12   : > { %s2141_s14 = smov [#allocation8]   ;;  %s2238_s23 = sadd.s32 1, %s2135_s18  }
  0x13   : > { %1871 = dma.hbm_to_vmem [thread:$0]  (!%p2222_p10), %s154_s25, 6272, %s156_s28, [#allocation6], %s2138_s7, %s2138_s7, %s2139_s8  }
  0x14   : > { %1874 = dma.hbm_to_vmem [thread:$0]  (!%p2222_p10), %s168_s6, 5120, %s170_s10, [#allocation6], %s2138_s7, %s2138_s7, %s2139_s8  }
  0x15   : > { %s184_s20 = sshll.u32 %s2141_s14, 4  ;;  %s26_s24 = ssub.s32 %s2135_s18, %s2238_s23  ;;  %s185_s20 = int_to_ptr.vmem [resolvable:$true] %s184_s20 }
  0x16   : > { %1877 = dma.hbm_to_vmem [thread:$0]  (!%p2222_p10), %s183_s13, 128, %s185_s20, [#allocation9]  }
  0x17   : > { %s29_s25 = sadd.s32 1, %s2131_s17  ;;  %p27_p12 = scmp.eq.s32.totalorder %s26_s24, 0 }
  0x18   : > { %p36_p13 = scmp.ne.s32.totalorder %s2131_s17, %s2127_s16  ;;  %p37_p0 = scmp.eq.s32.totalorder %s2135_s18, 0 }
  0x19   : > { %p1889_p3 = scmp.lt.s32.totalorder %s2135_s18, 2  ;;  %s195_s30 = sand.u32 1, %s2131_s17  }
  0x1a   : > { %s2250_s27 = scalar_select %p27_p12, %s2131_s17, %s29_s25  }
  0x1b   : > { %p38_p5 = por %p37_p0, %p36_p13  ;;  %p2254_p7 = por %p129_p2, %p36_p13 }
  0x1c   : > { %s1850_s5 = smul.u32 56, %s2135_s18  ;;  %s196_s13 = scalar_lea.sflag [#allocation3], %s195_s30 }
  0x1d   : > { %s1849_s6 = smul.u32 56, %s195_s30  ;;  %p2263_p9 = pnand %p1889_p3, %p38_p5 }
  0x1e   : > { %s205_s8 = scalar_lea.hbm %s2346_s0, %s1850_s5  ;;  %s2038_s5 = scalar_lea.hbm %s2346_s0, 112 }
  0x1f   : > { %s206_s10 = sshll.u32 %s205_s8, 4  ;;  %s199_s11 = scalar_lea.vmem [#allocation2], %s1849_s6  ;;  %s207_s10 = int_to_ptr.hbm [resolvable:$true] %s206_s10 }
  0x20   : > { %s208_s12 = sshll.u32 %s199_s11, 4  ;;  %s2031_s14 = sshra.s32 %s207_s10, 4  ;;  %s209_s12 = int_to_ptr.vmem [resolvable:$true] %s208_s12  ;;  %s2032_s14 = int_to_ptr.hbm [resolvable:$true] %s2031_s14 }
  0x21   : > { %s2033_s20 = scalar_lea.hbm %s2032_s14, 56  ;;  %p2035_p10 = pneg %p2263_p9 }
  0x22   : > { %p2034_p2 = scmp.ne.s32.totalorder %s2032_s14, %s2033_s20  ;;  %p2039_p0 = scmp.lt.s32.totalorder %s2032_s14, %s2346_s0 }
  0x23   : > { %p2040_p3 = scmp.lt.s32.totalorder %s2038_s5, %s2033_s20 }
  0x24   : > { %p2036_p12 = pnand %p2035_p10, %p2034_p2 }
  0x25   : > { %p2041_p5 = por %p2040_p3, %p2039_p0 }
  0x26   : > { %p2037_p13 = pneg %p2036_p12 }
  0x28   : > { %p2042_p11 = pnand %p2041_p5, %p2037_p13 }
  0x2a   : > { %2045 = shalt.err (!%p2042_p11)
}
  0x2b   : > { %s2142_s30 = smov 448   ;;  %s2143_s6 = smov 28  }
  0x2c   : > { %1881 = dma.hbm_to_vmem [thread:$0]  (!%p2263_p9), %s207_s10, 896, %s209_s12, %s196_s13, %s2142_s30, %s2142_s30, %s2143_s6  }
  0x2d   : > { %220 = sbr.rel (%p2214_p8) target bundleno = 981 (0x3d5), region = 36  ;;  %s2280_s8 = sand.u32 (!%p2214_p8), 1, %s2127_s16  }
  0x2e   : > { %s1851_s11 = smul.u32 (!%p2214_p8), 56, %s2280_s8  ;;  %s223_s14 = scalar_lea.sflag (!%p2214_p8), [#allocation3], %s2280_s8 }
  0x30   : > { %s2284_s20 = scalar_lea.vmem (!%p2214_p8), [#allocation2], %s1851_s11 }
  0x32   : > { %2106 = dma.done.wait (%p2201_p4), %s223_s14, 896  }
  0x33   : > { %2108 = vsyncadd (%p2201_p4), %s223_s14, 4294966400 }
  0x34   : > { %2110 = dma.done.wait (%p43_p1), [#allocation6], 11392  }
  0x35   : > { %2112 = vsyncadd (%p43_p1), [#allocation6], 4294955904 }
  0x36   : > { %2114 = dma.done.wait (%p43_p1), [#allocation9], 128  }
  0x37   : > { %2116 = vsyncadd (%p43_p1), [#allocation9], 4294967168  ;;  %v1766_v0 = vld [vmem:[#allocation5 + $0x38] sm:$0xff]  ;;  %v1765_v4 = vld [vmem:[#allocation5 + $0x30] sm:$0xff]  ;;  %vm707_vm0 = vcmask 130048   ;;  %s1361_s21 = sshll.u32 %s2280_s8, 4 }
  0x38   : > { %v1774_v1 = vld [vmem:[#allocation5 + $0x78] sm:$0xff]  ;;  %711 = vmatpush.bf16.msra.mxu0 %v1766_v0  ;;  %v1773_v5 = vld [vmem:[#allocation5 + $0x70] sm:$0xff]  ;;  %v1764_v8 = vld [vmem:[#allocation5 + $0x28] sm:$0xff]  ;;  %s1848_s26 = sshll.u32 %s2192_s19, 4  ;;  %s266_s13 = scalar_lea.vmem [#allocation10], %s1361_s21 }
  0x39   : > { %v1782_v2 = vld [vmem:[#allocation5 + $0xb8] sm:$0xff]  ;;  %725 = vmatpush.bf16.msra.mxu1 %v1774_v1  ;;  %v1781_v6 = vld [vmem:[#allocation5 + $0xb0] sm:$0xff]  ;;  %v1772_v9 = vld [vmem:[#allocation5 + $0x68] sm:$0xff]  ;;  %s1242_s12 = scalar_lea.hbm %s2350_s4, %s1848_s26  ;;  %s1243_s24 = sshll.u32 %s266_s13, 4  ;;  %s1244_s24 = int_to_ptr.vmem [resolvable:$true] %s1243_s24 }
  0x3a   : > { %v1790_v3 = vld [vmem:[#allocation5 + $0xf8] sm:$0xff]  ;;  %739 = vmatpush.bf16.msra.mxu2 %v1782_v2  ;;  %v1789_v7 = vld [vmem:[#allocation5 + $0xf0] sm:$0xff]  ;;  %v1780_v10 = vld [vmem:[#allocation5 + $0xa8] sm:$0xff]  ;;  %s1245_s25 = sshll.u32 %s1242_s12, 4  ;;  %s1231_s5 = scalar_lea.sflag [#allocation4], %s2280_s8  ;;  %s1246_s25 = int_to_ptr.hbm [resolvable:$true] %s1245_s25 }
  0x3b   : > { %753 = vmatpush.bf16.msra.mxu3 %v1790_v3  ;;  %v1788_v11 = vld [vmem:[#allocation5 + $0xe8] sm:$0xff]  ;;  %v1763_v12 = vld [vmem:[#allocation5 + $0x20] sm:$0xff]  ;;  %v1762_v16 = vld [vmem:[#allocation5 + $0x18] sm:$0xff]  ;;  %s2075_s29 = sshra.s32 %s1246_s25, 4  ;;  %s2081_s6 = scalar_lea.hbm %s2350_s4, 32  ;;  %s2076_s29 = int_to_ptr.hbm [resolvable:$true] %s2075_s29 }
  0x3c   : > { %712 = vmatpush.bf16.msra.mxu0 %v1765_v4  ;;  %v1771_v13 = vld [vmem:[#allocation5 + $0x60] sm:$0xff]  ;;  %v1770_v17 = vld [vmem:[#allocation5 + $0x58] sm:$0xff]  ;;  %v1761_v20 = vld [vmem:[#allocation5 + $0x10] sm:$0xff]  ;;  %s2077_s19 = scalar_lea.hbm %s2076_s29, 16  ;;  %p2082_p11 = scmp.lt.s32.totalorder %s2076_s29, %s2350_s4 }
  0x3d   : > { %726 = vmatpush.bf16.msra.mxu1 %v1773_v5  ;;  %v1779_v14 = vld [vmem:[#allocation5 + $0xa0] sm:$0xff]  ;;  %v1778_v18 = vld [vmem:[#allocation5 + $0x98] sm:$0xff]  ;;  %v1769_v21 = vld [vmem:[#allocation5 + $0x50] sm:$0xff]  ;;  %p2078_p1 = scmp.ne.s32.totalorder %s2076_s29, %s2077_s19  ;;  %p2083_p9 = scmp.lt.s32.totalorder %s2081_s6, %s2077_s19 }
  0x3e   : > { %740 = vmatpush.bf16.msra.mxu2 %v1781_v6  ;;  %v1787_v15 = vld [vmem:[#allocation5 + $0xe0] sm:$0xff]  ;;  %v1786_v19 = vld [vmem:[#allocation5 + $0xd8] sm:$0xff]  ;;  %v1777_v22 = vld [vmem:[#allocation5 + $0x90] sm:$0xff] }
  0x3f   : > { %754 = vmatpush.bf16.msra.mxu3 %v1789_v7  ;;  %v1785_v23 = vld [vmem:[#allocation5 + $0xd0] sm:$0xff]  ;;  %v1760_v24 = vld [vmem:[#allocation5 + $0x8] sm:$0xff]  ;;  %v1759_v28 = vld [vmem:[#allocation5] sm:$0xff]  ;;  %p2079_p4 = pnand %p2078_p1, %p2254_p7  ;;  %p2084_p2 = por %p2083_p9, %p2082_p11 }
  0x40   : > { %713 = vmatpush.bf16.msra.mxu0 %v1764_v8  ;;  %v1768_v25 = vld [vmem:[#allocation5 + $0x48] sm:$0xff]  ;;  %v1767_v29 = vld [vmem:[#allocation5 + $0x40] sm:$0xff]  ;;  %v1798_v34 = vld [vmem:[#allocation5 + $0x138] sm:$0xff] }
  0x41   : > { %727 = vmatpush.bf16.msra.mxu1 %v1772_v9  ;;  %v1776_v26 = vld [vmem:[#allocation5 + $0x88] sm:$0xff]  ;;  %v1806_v35 = vld [vmem:[#allocation5 + $0x178] sm:$0xff]  ;;  %v1775_v36 = vld [vmem:[#allocation5 + $0x80] sm:$0xff]  ;;  %p2080_p8 = pneg %p2079_p4 }
  0x42   : > { %741 = vmatpush.bf16.msra.mxu2 %v1780_v10  ;;  %v1784_v27 = vld [vmem:[#allocation5 + $0xc8] sm:$0xff]  ;;  %v1783_v37 = vld [vmem:[#allocation5 + $0xc0] sm:$0xff]  ;;  %v1372_v38 = vld [vmem:[%s2284_s20 + $0x8] sm:$0xf] }
  0x43   : > { %755 = vmatpush.bf16.msra.mxu3 %v1788_v11  ;;  %v1364_v30 = vld [vmem:[%s2284_s20] sm:$0xf]  ;;  %v1755_v31 = vld [vmem:[%s2284_s20 + $0x18] sm:$0xf0]  ;;  %v1752_v32 = vld [vmem:[%s2284_s20 + $0x4] sm:$0xf]  ;;  %p2085_p10 = pnand %p2084_p2, %p2080_p8 }
  0x44   : > { %714 = vmatpush.bf16.msra.mxu0 %v1763_v12  ;;  %v1366_v33 = vld [vmem:[%s2284_s20 + $0x1c] sm:$0xf0]  ;;  %v1756_v39 = vld [vmem:[%s2284_s20 + $0x20] sm:$0xf0]  ;;  %v1365_v40 = vor.u32 %v1755_v31, %v1364_v30  ;;  %v1753_v41 = vld [vmem:[%s2284_s20 + $0xc] sm:$0xf] }
  0x45   : > { %728 = vmatpush.bf16.msra.mxu1 %v1771_v13  ;;  %v1374_v42 = vld [vmem:[%s2284_s20 + $0x24] sm:$0xf0]  ;;  %v1369_v43 = vor.u32 %v1752_v32, %v1366_v33  ;;  %v1807_v44 = vld [vmem:[#allocation5 + $0x180] sm:$0xff]  ;;  %v1373_v47 = vor.u32 %v1756_v39, %v1372_v38  ;;  %v1796_v49 = vld [vmem:[#allocation5 + $0x128] sm:$0xff] }
  0x46   : > { %742 = vmatpush.bf16.msra.mxu2 %v1779_v14  ;;  %v1797_v45 = vld [vmem:[#allocation5 + $0x130] sm:$0xff]  ;;  %v1377_v48 = vor.u32 %v1753_v41, %v1374_v42  ;;  %v1804_v50 = vld [vmem:[#allocation5 + $0x168] sm:$0xff]  ;;  %v1795_v51 = vld [vmem:[#allocation5 + $0x120] sm:$0xff] }
  0x47   : > { %756 = vmatpush.bf16.msra.mxu3 %v1787_v15  ;;  %v1805_v46 = vld [vmem:[#allocation5 + $0x170] sm:$0xff]  ;;  %v1803_v52 = vld [vmem:[#allocation5 + $0x160] sm:$0xff]  ;;  %v1794_v53 = vld [vmem:[#allocation5 + $0x118] sm:$0xff] }
  0x48   : > { %715 = vmatpush.bf16.msra.mxu0 %v1762_v16  ;;  %v1802_v54 = vld [vmem:[#allocation5 + $0x158] sm:$0xff]  ;;  %v1388_v55 = vld [vmem:[%s2284_s20 + $0x18] sm:$0xf]  ;;  %v1793_v57 = vld [vmem:[#allocation5 + $0x110] sm:$0xff] }
  0x49   : > { %729 = vmatpush.bf16.msra.mxu1 %v1770_v17  ;;  %v1758_v56 = vld [vmem:[%s2284_s20 + $0x30] sm:$0xf0]  ;;  %v1801_v58 = vld [vmem:[#allocation5 + $0x150] sm:$0xff]  ;;  %v1792_v60 = vld [vmem:[#allocation5 + $0x108] sm:$0xff] }
  0x4a   : > { %743 = vmatpush.bf16.msra.mxu2 %v1778_v18  ;;  %v1389_v59 = vor.u32 %v1758_v56, %v1388_v55  ;;  %v1800_v61 = vld [vmem:[#allocation5 + $0x148] sm:$0xff]  ;;  %v1791_v62 = vld [vmem:[#allocation5 + $0x100] sm:$0xff]  ;;  %v1757_v1 = vld [vmem:[%s2284_s20 + $0x28] sm:$0xf0] }
  0x4b   : > { %757 = vmatpush.bf16.msra.mxu3 %v1786_v19  ;;  %v1799_v63 = vld [vmem:[#allocation5 + $0x140] sm:$0xff]  ;;  %v1814_v7 = vld [vmem:[#allocation7 + $0x30] sm:$0xff]  ;;  %v1813_v8 = vld [vmem:[#allocation7 + $0x28] sm:$0xff] }
  0x4c   : > { %716 = vmatpush.bf16.msra.mxu0 %v1761_v20  ;;  %v1380_v0 = vld [vmem:[%s2284_s20 + $0x10] sm:$0xf]  ;;  %v1754_v2 = vld [vmem:[%s2284_s20 + $0x14] sm:$0xf]  ;;  %v1812_v9 = vld [vmem:[#allocation7 + $0x20] sm:$0xff] }
  0x4d   : > { %730 = vmatpush.bf16.msra.mxu1 %v1769_v21  ;;  %v1382_v3 = vld [vmem:[%s2284_s20 + $0x2c] sm:$0xf0]  ;;  %v1381_v4 = vor.u32 %v1757_v1, %v1380_v0  ;;  %v1809_v12 = vld [vmem:[#allocation7 + $0x8] sm:$0xff]  ;;  %v1808_v16 = vld [vmem:[#allocation7] sm:$0xff] }
  0x4e   : > { %744 = vmatpush.bf16.msra.mxu2 %v1777_v22  ;;  %v1385_v5 = vor.u32 %v1754_v2, %v1382_v3  ;;  %v1815_v6 = vld [vmem:[#allocation7 + $0x38] sm:$0xff]  ;;  %v1810_v11 = vld [vmem:[#allocation7 + $0x10] sm:$0xff]  ;;  %v1935_v17 = vld [vmem:[#allocation8] ss:$0 sm:$0xff] }
  0x4f   : > { %758 = vmatpush.bf16.msra.mxu3 %v1785_v23  ;;  %v1811_v10 = vld [vmem:[#allocation7 + $0x18] sm:$0xff]  ;;  %v1822_v20 = vld [vmem:[#allocation7 + $0x70] sm:$0xff]  ;;  %v1829_v56 = vld [vmem:[#allocation7 + $0xa8] sm:$0xff] }
  0x50   : > { %717 = vmatpush.bf16.msra.mxu0 %v1760_v24  ;;  %v1823_v18 = vld [vmem:[#allocation7 + $0x78] sm:$0xff]  ;;  %v1830_v55 = vld [vmem:[#allocation7 + $0xb0] sm:$0xff] }
  0x51   : > { %731 = vmatpush.bf16.msra.mxu1 %v1768_v25  ;;  %v1821_v25 = vld [vmem:[#allocation7 + $0x68] sm:$0xff]  ;;  %v1827_v2 = vld [vmem:[#allocation7 + $0x98] sm:$0xff]  ;;  %v1826_v3 = vld [vmem:[#allocation7 + $0x90] sm:$0xff] }
  0x52   : > { %745 = vmatpush.bf16.msra.mxu2 %v1776_v26 }
  0x53   : > { %759 = vmatpush.bf16.msra.mxu3 %v1784_v27 }
  0x54   : > { %718 = vmatpush.bf16.msra.mxu0 %v1759_v28 }
  0x55   : > { %732 = vmatpush.bf16.msra.mxu1 %v1767_v29  ;;  %v1820_v29 = vld [vmem:[#allocation7 + $0x60] sm:$0xff] }
  0x56   : > { %746 = vmatpush.bf16.msra.mxu2 %v1775_v36 }
  0x57   : > { %760 = vmatpush.bf16.msra.mxu3 %v1783_v37  ;;  %719 = vmatmul.bf16.vlgmr.msra.gmra.mxu0 %v1365_v40 }
  0x58   : > { %767 = vmatpush.bf16.msrb.mxu0 %v1798_v34  ;;  %733 = vmatmul.bf16.vlgmr.msra.gmra.mxu1 %v1369_v43 }
  0x59   : > { %781 = vmatpush.bf16.msrb.mxu1 %v1806_v35  ;;  %747 = vmatmul.bf16.vlgmr.msra.gmra.mxu2 %v1373_v47 }
  0x5a   : > { %802 = vmatpush.bf16.msrb.mxu2 %v1807_v44  ;;  %761 = vmatmul.bf16.vlgmr.msra.gmra.mxu3 %v1377_v48 }
  0x5b   : > { %878 = vmatpush.bf16.msrb.mxu3 %v1815_v6  ;;  %v1839_v6 = vld [vmem:[#allocation7 + $0xf8] sm:$0xff] }
  0x5c   : > { %768 = vmatpush.bf16.msrb.mxu0 %v1797_v45 }
  0x5d   : > { %782 = vmatpush.bf16.msrb.mxu1 %v1805_v46 }
  0x5e   : > { %962 = vmatpush.bf16.msra.mxu2 %v1823_v18  ;;  %v1835_v18 = vld [vmem:[#allocation7 + $0xd8] sm:$0xff] }
  0x5f   : > { %879 = vmatpush.bf16.msrb.mxu3 %v1814_v7  ;;  %v1838_v7 = vld [vmem:[#allocation7 + $0xf0] sm:$0xff] }
  0x60   : > { %769 = vmatpush.bf16.msrb.mxu0 %v1796_v49 }
  0x61   : > { %783 = vmatpush.bf16.msrb.mxu1 %v1804_v50  ;;  %v1819_v50 = vld [vmem:[#allocation7 + $0x58] sm:$0xff] }
  0x62   : > { %963 = vmatpush.bf16.msra.mxu2 %v1822_v20  ;;  %v1833_v20 = vld [vmem:[#allocation7 + $0xc8] sm:$0xff] }
  0x63   : > { %880 = vmatpush.bf16.msrb.mxu3 %v1813_v8  ;;  %v1837_v8 = vld [vmem:[#allocation7 + $0xe8] sm:$0xff] }
  0x64   : > { %770 = vmatpush.bf16.msrb.mxu0 %v1795_v51  ;;  %v1818_v51 = vld [vmem:[#allocation7 + $0x50] sm:$0xff] }
  0x65   : > { %784 = vmatpush.bf16.msrb.mxu1 %v1803_v52  ;;  %v1817_v52 = vld [vmem:[#allocation7 + $0x48] sm:$0xff] }
  0x66   : > { %964 = vmatpush.bf16.msra.mxu2 %v1821_v25  ;;  %v1844_v25 = vld [vmem:[#allocation7 + $0x120] sm:$0xff] }
  0x67   : > { %881 = vmatpush.bf16.msrb.mxu3 %v1812_v9  ;;  %v1836_v9 = vld [vmem:[#allocation7 + $0xe0] sm:$0xff] }
  0x68   : > { %771 = vmatpush.bf16.msrb.mxu0 %v1794_v53  ;;  %v1816_v53 = vld [vmem:[#allocation7 + $0x40] sm:$0xff] }
  0x69   : > { %785 = vmatpush.bf16.msrb.mxu1 %v1802_v54  ;;  %1586 = vmatmul.msk.bf16.vlgmr.msrb.gmra.mxu2 %vm707_vm0, %v1389_v59  ;;  %v1831_v54 = vld [vmem:[#allocation7 + $0xb8] sm:$0xff]  ;;  %v1936_v59 = vld [vmem:[#allocation8 + $0x1] ss:$0 sm:$0xff] }
  0x6a   : > { %965 = vmatpush.bf16.msra.mxu2 %v1820_v29 }
  0x6b   : > { %882 = vmatpush.bf16.msrb.mxu3 %v1811_v10 }
  0x6c   : > { %772 = vmatpush.bf16.msrb.mxu0 %v1793_v57  ;;  %v1828_v57 = vld [vmem:[#allocation7 + $0xa0] sm:$0xff] }
  0x6d   : > { %786 = vmatpush.bf16.msrb.mxu1 %v1801_v58 }
  0x6e   : > { %966 = vmatpush.bf16.msra.mxu2 %v1819_v50 }
  0x6f   : > { %883 = vmatpush.bf16.msrb.mxu3 %v1810_v11  ;;  %v1937_v11 = vld [vmem:[#allocation8 + $0x2] ss:$0 sm:$0xff] }
  0x70   : > { %773 = vmatpush.bf16.msrb.mxu0 %v1792_v60 }
  0x71   : > { %787 = vmatpush.bf16.msrb.mxu1 %v1800_v61 }
  0x72   : > { %967 = vmatpush.bf16.msra.mxu2 %v1818_v51 }
  0x73   : > { %884 = vmatpush.bf16.msrb.mxu3 %v1809_v12 }
  0x74   : > { %774 = vmatpush.bf16.msrb.mxu0 %v1791_v62 }
  0x75   : > { %788 = vmatpush.bf16.msrb.mxu1 %v1799_v63 }
  0x76   : > { %968 = vmatpush.bf16.msra.mxu2 %v1817_v52 }
  0x77   : > { %775 = vmatmul.bf16.vlgmr.msrb.gmra.mxu0 %v1381_v4  ;;  %885 = vmatpush.bf16.msrb.mxu3 %v1808_v16  ;;  %v1825_v4 = vld [vmem:[#allocation7 + $0x88] sm:$0xff] }
  0x78   : > { %789 = vmatmul.bf16.vlgmr.msrb.gmra.mxu1 %v1385_v5  ;;  %1046 = vmatpush.bf16.msra.mxu0 %v1831_v54  ;;  %v1824_v5 = vld [vmem:[#allocation7 + $0x80] sm:$0xff] }
  0x79   : > { %1130 = vmatpush.bf16.msra.mxu1 %v1839_v6 }
  0x7a   : > { %969 = vmatpush.bf16.msra.mxu2 %v1816_v53 }
  0x7c   : > { %1047 = vmatpush.bf16.msra.mxu0 %v1830_v55 }
  0x7d   : > { %1131 = vmatpush.bf16.msra.mxu1 %v1838_v7 }
  0x80   : > { %1048 = vmatpush.bf16.msra.mxu0 %v1829_v56 }
  0x81   : > { %1132 = vmatpush.bf16.msra.mxu1 %v1837_v8 }
  0x84   : > { %1049 = vmatpush.bf16.msra.mxu0 %v1828_v57 }
  0x85   : > { %1133 = vmatpush.bf16.msra.mxu1 %v1836_v9 }
  0x88   : > { %1050 = vmatpush.bf16.msra.mxu0 %v1827_v2 }
  0x89   : > { %1134 = vmatpush.bf16.msra.mxu1 %v1835_v18 }
  0x8c   : > { %1051 = vmatpush.bf16.msra.mxu0 %v1826_v3 }
  0x90   : > { %1052 = vmatpush.bf16.msra.mxu0 %v1825_v4 }
  0x94   : > { %1053 = vmatpush.bf16.msra.mxu0 %v1824_v5 }
  0xd4   : > { %v720_v13 = vpop.f32.mrf.mxu0 }
  0xd5   : > { %v734_v14 = vpop.f32.mrf.mxu1  ;;  %v721_v19 = vadd.f32 %v1935_v17, %v720_v13 }
  0xd7   : > { %v735_v24 = vadd.f32 %v734_v14, %v721_v19  ;;  %v1834_v19 = vld [vmem:[#allocation7 + $0xd0] sm:$0xff] }
  0xd8   : > { %1135 = vmatpush.bf16.msra.mxu1 %v1834_v19 }
  0xdc   : > { %v748_v15 = vpop.f32.mrf.mxu2  ;;  %v722_v21 = vpop.f32.mrf.mxu0  ;;  %1136 = vmatpush.bf16.msra.mxu1 %v1833_v20 }
  0xdd   : > { %v736_v22 = vpop.f32.mrf.mxu1  ;;  %v762_v26 = vpop.f32.mrf.mxu3  ;;  %v723_v27 = vadd.f32 %v1935_v17, %v722_v21  ;;  %v749_v28 = vadd.f32 %v748_v15, %v735_v24  ;;  %v1832_v21 = vld [vmem:[#allocation7 + $0xc0] sm:$0xff]  ;;  %v1845_v24 = vld [vmem:[#allocation7 + $0x128] sm:$0xff] }
  0xdf   : > { %v737_v30 = vadd.f32 %v736_v22, %v723_v27  ;;  %v763_v33 = vadd.f32 %v762_v26, %v749_v28  ;;  %v1847_v22 = vld [vmem:[#allocation7 + $0x138] sm:$0xff]  ;;  %v1938_v27 = vld [vmem:[#allocation8 + $0x3] ss:$0 sm:$0xff] }
  0xe0   : > { %1137 = vmatpush.bf16.msra.mxu1 %v1832_v21  ;;  %1214 = vmatpush.bf16.msra.mxu3 %v1847_v22 }
  0xe4   : > { %v750_v23 = vpop.f32.mrf.mxu2 }
  0xe5   : > { %v751_v35 = vadd.f32 %v750_v23, %v737_v30  ;;  %v764_v37 = vpop.f32.mrf.mxu3  ;;  %v1846_v23 = vld [vmem:[#allocation7 + $0x130] sm:$0xff] }
  0xe6   : > { %1215 = vmatpush.bf16.msra.mxu3 %v1846_v23 }
  0xe7   : > { %v765_v38 = vadd.f32 %v764_v37, %v751_v35  ;;  %v1842_v35 = vld [vmem:[#allocation7 + $0x110] sm:$0xff]  ;;  %v1840_v37 = vld [vmem:[#allocation7 + $0x100] sm:$0xff] }
  0xea   : > { %1216 = vmatpush.bf16.msra.mxu3 %v1845_v24 }
  0xec   : > { %v804_v34 = vpop.f32.mrf.mxu2 }
  0xee   : > { %1217 = vmatpush.bf16.msra.mxu3 %v1844_v25 }
  0xf4   : > { %v776_v31 = vpop.f32.mrf.mxu0  ;;  %v806_v45 = vpop.f32.mrf.mxu2 }
  0xf5   : > { %v790_v32 = vpop.f32.mrf.mxu1  ;;  %v777_v36 = vadd.f32 %v776_v31, %v763_v33 }
  0xf7   : > { %v791_v39 = vadd.f32 %v790_v32, %v777_v36  ;;  %v1841_v36 = vld [vmem:[#allocation7 + $0x108] sm:$0xff] }
  0xf9   : > { %v805_v43 = vadd.f32 %v804_v34, %v791_v39  ;;  %v1843_v34 = vld [vmem:[#allocation7 + $0x118] sm:$0xff]  ;;  %v1939_v39 = vld [vmem:[#allocation8 + $0x4] ss:$0 sm:$0xff] }
  0xfa   : > { %1218 = vmatpush.bf16.msra.mxu3 %v1843_v34 }
  0xfb   : > { %v809_v47 = vmax.f32 %v805_v43, 0.0 }
  0xfc   : > { %v778_v40 = vpop.f32.mrf.mxu0 }
  0xfd   : > { %v779_v41 = vadd.f32 %v778_v40, %v765_v38  ;;  %v792_v42 = vpop.f32.mrf.mxu1 }
  0xfe   : > { %1219 = vmatpush.bf16.msra.mxu3 %v1842_v35 }
  0xff   : > { %v793_v44 = vadd.f32 %v792_v42, %v779_v41 }
 0x101   : > { %v807_v46 = vadd.f32 %v806_v45, %v793_v44 }
 0x102   : > { %1220 = vmatpush.bf16.msra.mxu3 %v1841_v36 }
 0x103   : > { %v810_v48 = vmax.f32 %v807_v46, 0.0  ;;  %v1940_v46 = vld [vmem:[#allocation8 + $0x5] ss:$0 sm:$0xff] }
 0x105   : > { %v811_v49 = vpack.c.bf16 %v810_v48, %v809_v47 }
 0x106   : > { %1221 = vmatpush.bf16.msra.mxu3 %v1840_v37 }
 0x107   : > { %886 = vmatmul.bf16.vlgmr.msrb.gmra.mxu3 %v811_v49 }
 0x18a   : > { %v887_v58 = vpop.f32.mrf.mxu3 }
 0x18b   : > { %v888_v60 = vadd.f32 %v1936_v59, %v887_v58 }
 0x18d   : > { %v892_v63 = vmax.f32 %v888_v60, 0.0 }
 0x192   : > { %v889_v61 = vpop.f32.mrf.mxu3 }
 0x193   : > { %v890_v62 = vadd.f32 %v1936_v59, %v889_v61 }
 0x195   : > { %v893_v0 = vmax.f32 %v890_v62, 0.0 }
 0x197   : > { %v894_v1 = vpack.c.bf16 %v893_v0, %v892_v63 }
 0x199   : > { %970 = vmatmul.bf16.vlgmr.msra.gmra.mxu2 %v894_v1 }
 0x21c   : > { %v971_v10 = vpop.f32.mrf.mxu2 }
 0x21d   : > { %v972_v12 = vadd.f32 %v1937_v11, %v971_v10 }
 0x21f   : > { %v976_v15 = vmax.f32 %v972_v12, 0.0 }
 0x224   : > { %v973_v13 = vpop.f32.mrf.mxu2 }
 0x225   : > { %v974_v14 = vadd.f32 %v1937_v11, %v973_v13 }
 0x227   : > { %v977_v16 = vmax.f32 %v974_v14, 0.0 }
 0x229   : > { %v978_v17 = vpack.c.bf16 %v977_v16, %v976_v15 }
 0x22b   : > { %1054 = vmatmul.bf16.vlgmr.msra.gmra.mxu0 %v978_v17 }
 0x2a8   : > { %v1055_v26 = vpop.f32.mrf.mxu0 }
 0x2a9   : > { %v1056_v28 = vadd.f32 %v1938_v27, %v1055_v26 }
 0x2ab   : > { %v1060_v31 = vmax.f32 %v1056_v28, 0.0 }
 0x2b0   : > { %v1057_v29 = vpop.f32.mrf.mxu0 }
 0x2b1   : > { %v1058_v30 = vadd.f32 %v1938_v27, %v1057_v29 }
 0x2b3   : > { %v1061_v32 = vmax.f32 %v1058_v30, 0.0 }
 0x2b5   : > { %v1062_v33 = vpack.c.bf16 %v1061_v32, %v1060_v31 }
 0x2b7   : > { %1138 = vmatmul.bf16.vlgmr.msra.gmra.mxu1 %v1062_v33 }
 0x334   : > { %v1139_v38 = vpop.f32.mrf.mxu1 }
 0x335   : > { %v1140_v40 = vadd.f32 %v1939_v39, %v1139_v38 }
 0x337   : > { %v1144_v43 = vmax.f32 %v1140_v40, 0.0 }
 0x33c   : > { %v1141_v41 = vpop.f32.mrf.mxu1 }
 0x33d   : > { %v1142_v42 = vadd.f32 %v1939_v39, %v1141_v41 }
 0x33f   : > { %v1145_v44 = vmax.f32 %v1142_v42, 0.0 }
 0x341   : > { %v1146_v45 = vpack.c.bf16 %v1145_v44, %v1144_v43 }
 0x343   : > { %1222 = vmatmul.bf16.vlgmr.msra.gmra.mxu3 %v1146_v45 }
 0x3c6   : > { %v1223_v47 = vpop.f32.mrf.mxu3 }
 0x3c7   : > { %v1224_v48 = vadd.f32 %v1940_v46, %v1223_v47 }
 0x3c9   : > { %1228 = vst [vmem:[%s266_s13] sm:$0xff] %v1224_v48 }
 0x3ce   : > { %v1225_v49 = vpop.f32.mrf.mxu3 }
 0x3cf   : > { %v1226_v50 = vadd.f32 %v1940_v46, %v1225_v49 }
 0x3d1   : > { %1229 = vst [vmem:[%s266_s13 + $0x8] sm:$0xff] %v1226_v50 }
 0x3d2   : > { %2088 = shalt.err (!%p2085_p10)
}
 0x3d3   : > { %s2144_s8 = smov 128   ;;  %s2145_s20 = smov 8  }
 0x3d4   : > { %1866 = dma.vmem_to_hbm [thread:$0]  (%p2254_p7), %s1244_s24, 256, %s1246_s25, %s1231_s5, %s2144_s8, %s2144_s8, %s2145_s20  }
 0x3d5 PF: > { %s1260_s21 = sand.u32 1, %s2123_s15   ;;  %p2357_p12 = scmp.ge.s32.totalorder %s2135_s18, 2 }
 0x3d6   : > { %s1261_s26 = scalar_lea.sflag [#allocation4], %s1260_s21 }
 0x3d7   : > { %p1883_p13 = pnand %p2357_p12, %p2206_p6 }
 0x3d9   : > { %p1884_p0 = pneg %p1883_p13 }
 0x3db   : > { %2118 = dma.done.wait (%p1884_p0), %s1261_s26, 256  }
 0x3dc   : > { %2120 = vsyncadd (%p1884_p0), %s1261_s26, 4294967040  ;;  %p19_p3 = scmp.ge.s32.totalorder %s2238_s23, 4   ;;  %s2358_s15 = smov %s2127_s16 }
 0x3dd   : > { %s2359_s16 = smov %s2131_s17  ;;  %s2360_s17 = smov %s2250_s27 }
 0x3de   : > { %s2361_s18 = smov %s2238_s23  ;;  %21 = sbr.rel (!%p19_p3) target bundleno = 7 (0x7), region = 97 }
 0x3e3   :  { %1267 = vsyncpa [#allocation3], 1 }
 0x3e4   :  { %1269 = vsyncpa [#allocation3 + $0x1], 1 }
 0x3e5   :  { %1270 = vsyncpa [#allocation6], 1 }
 0x3e6   :  { %1271 = vsyncpa [#allocation9], 1 }
 0x3e7   :  { %1272 = vsyncpa [#allocation4], 1 }
 0x3e8   :  { %1274 = vsyncpa [#allocation4 + $0x1], 1 }

</bundles_post_ra>
